<compile_context>
chip_gen: v5e
topology: v5e:2x2
jax: 0.10.0
libtpu: 0.0.40
codegen_flags: <defaults>
</compile_context>

<pallas_src>
import functools
import math

import numpy as np

import jax
import jax.numpy as jnp
from jax.experimental import pallas as pl
from jax.experimental.pallas import tpu as pltpu


# -----------------------------------------------------------------------------
# Host-side interpolation matrices (PyTorch align_corners=False semantics).
# -----------------------------------------------------------------------------
@functools.lru_cache(maxsize=None)
def _interp_weights(h_in, w_in, h_out, w_out, g):
    def mat(out_size, in_size):
        scale = in_size / out_size                       # PyTorch convention
        o = np.arange(out_size, dtype=np.float64)
        src = np.maximum((o + 0.5) * scale - 0.5, 0.0)   # clamp negative src
        i0 = np.minimum(np.floor(src).astype(np.int64), in_size - 1)
        frac = (src - i0).astype(np.float32)
        i1 = np.minimum(i0 + 1, in_size - 1)
        m = np.zeros((out_size, in_size), dtype=np.float32)
        m[np.arange(out_size), i0] += 1.0 - frac
        m[np.arange(out_size), i1] += frac
        return m

    wh = mat(h_out, h_in)                                        # (H_out, H)
    wbd = np.kron(np.eye(g, dtype=np.float32), wh)               # (g*H_out, g*H)
    wwt = np.ascontiguousarray(mat(w_out, w_in).T)               # (W, W_out)
    return wbd, wwt


# -----------------------------------------------------------------------------
# Generation-aware tiling.
# -----------------------------------------------------------------------------
def _round_up(a, m):
    return ((a + m - 1) // m) * m


def _pow2_divisor(n):
    return n & -n


@functools.lru_cache(maxsize=None)
def _vmem_capacity_bytes():
    try:
        info = pltpu.get_tpu_info()
        v = getattr(info, "vmem_capacity_bytes", None)
        if v:
            return int(v)
    except Exception:
        pass
    return 64 << 20  # conservative fallback (v7x-sized VMEM)


def _pick_tiling(nc, h, w, h_out, w_out, itemsize):
    """Returns (g, tb, grid_steps, vmem_limit_bytes)."""
    small_vmem = _vmem_capacity_bytes() <= (64 << 20)   # v7x-class: 64 MiB, 2 TCs
    budget = (22 << 20) if small_vmem else (48 << 20)

    # Plane-group size for the block-diagonal H-pass: fill the MXU K dim.
    g = max(1, min(16, 128 // max(1, h), nc))

    # tb (planes per grid step) must keep both blocks' sublane dims aligned to
    # the hardware tile and be a multiple of the group size.
    sub = 8 * max(1, 4 // itemsize)                      # 8 rows f32 / 16 rows bf16
    sr1 = sub // math.gcd(sub, h)
    sr2 = sub // math.gcd(sub, h_out)
    sub_req = sr1 * sr2 // math.gcd(sr1, sr2)
    mult = g * sub_req // math.gcd(g, sub_req)           # lcm(g, sub_req)

    lane_in = _round_up(w, 128)
    lane_out = _round_up(w_out, 128)
    per_plane = 2 * itemsize * (h * lane_in + h_out * lane_out)   # double-buffered
    cap = max(1, int(budget // max(1, per_plane)))

    tb = (min(cap, nc) // mult) * mult
    if tb == 0:
        tb = mult if mult <= nc else nc                  # whole-array fallback
    if tb % g:
        g = math.gcd(g, tb)                              # keep groups exact

    steps = pl.cdiv(nc, tb)
    if small_vmem and steps % 2 == 1 and nc > mult:
        # Two TensorCores share the 'parallel' grid axis: prefer an even
        # number of steps so neither core idles on the tail.
        for cand in (steps + 1, steps + 3, steps + 5):
            tb_try = _round_up(pl.cdiv(nc, cand), mult)
            if 0 < tb_try <= tb and pl.cdiv(nc, tb_try) % 2 == 0:
                tb = tb_try
                break
        steps = pl.cdiv(nc, tb)

    # VMEM touched: double-buffered blocks + resident weights + f32 group
    # intermediates, plus headroom for compiler scratch.
    est = (2 * itemsize * tb * (h * lane_in + h_out * lane_out)
           + 2 * itemsize * (_round_up(g * h_out, 8) * _round_up(g * h, 128)
                             + _round_up(w, 8) * lane_out)
           + 4 * _round_up(g * h_out, 8) * (lane_in + lane_out)
           + (12 << 20))
    ceiling = (44 << 20) if small_vmem else (100 << 20)
    vmem_limit = int(min(max(est, 32 << 20), ceiling))
    return g, tb, steps, vmem_limit


# -----------------------------------------------------------------------------
# Kernel: per grid step, TB planes; per plane-group, two 2-D MXU matmuls.
# -----------------------------------------------------------------------------
def _interp_kernel(wbd_ref, wwt_ref, x_ref, o_ref):
    gh_out, gh_in = wbd_ref.shape               # (g*H_out, g*H)
    groups = x_ref.shape[0] // gh_in            # TB // g  (static)

    wbd = wbd_ref[...]                          # block-diag H-interp weight
    wwt = wwt_ref[...]                          # transposed W-interp weight

    def one_group(r_in, r_out):
        xg = x_ref[pl.ds(r_in, gh_in), :]                               # (g*H, W)
        t = jnp.dot(wbd, xg, preferred_element_type=jnp.float32)        # (g*H_out, W)
        y = jnp.dot(t.astype(wwt.dtype), wwt,
                    preferred_element_type=jnp.float32)                 # (g*H_out, W_out)
        o_ref[pl.ds(r_out, gh_out), :] = y.astype(o_ref.dtype)

    if groups <= 8:
        for i in range(groups):                 # static, aligned offsets
            one_group(i * gh_in, i * gh_out)
    else:
        def body(i, carry):
            one_group(pl.multiple_of(i * gh_in, _pow2_divisor(gh_in)),
                      pl.multiple_of(i * gh_out, _pow2_divisor(gh_out)))
            return carry
        jax.lax.fori_loop(0, groups, body, 0)


# -----------------------------------------------------------------------------
# Wrapper.
# -----------------------------------------------------------------------------
@functools.partial(jax.jit, static_argnames=("scale_factor",))
def interpolate_bilinear(x, scale_factor):
    """Pallas equivalent of F.interpolate(x, scale_factor=s, mode='bilinear',
    align_corners=None) for 4-D NCHW input."""
    n, c, h, w = x.shape
    h_out = int(math.floor(h * scale_factor))
    w_out = int(math.floor(w * scale_factor))
    nc = n * c
    dt = x.dtype
    itemsize = jnp.dtype(dt).itemsize

    g, tb, steps, vmem_limit = _pick_tiling(nc, h, w, h_out, w_out, itemsize)
    wbd_np, wwt_np = _interp_weights(h, w, h_out, w_out, g)
    wbd = jnp.asarray(wbd_np, dtype=dt)          # (g*H_out, g*H), input dtype
    wwt = jnp.asarray(wwt_np, dtype=dt)          # (W, W_out),    input dtype

    x2 = x.reshape(nc * h, w)                    # free metadata reshape

    out2 = pl.pallas_call(
        _interp_kernel,
        out_shape=jax.ShapeDtypeStruct((nc * h_out, w_out), dt),
        grid=(steps,),
        in_specs=[
            pl.BlockSpec((g * h_out, g * h), lambda i: (0, 0)),   # Wh block-diag, VMEM resident
            pl.BlockSpec((w, w_out), lambda i: (0, 0)),           # Ww^T, VMEM resident
            pl.BlockSpec((tb * h, w), lambda i: (i, 0)),          # TB input planes
        ],
        out_specs=pl.BlockSpec((tb * h_out, w_out), lambda i: (i, 0)),
        compiler_params=pltpu.CompilerParams(
            dimension_semantics=("parallel",),
            vmem_limit_bytes=vmem_limit,
        ),
    )(wbd, wwt, x2)

    return out2.reshape(n, c, h_out, w_out)


if __name__ == "__main__":
    key0, key1 = jax.random.split(jax.random.PRNGKey(0), 2)

    # Small shape consistent with u2net's Interpolate(scale_factor=2, 'bilinear').
    x = jax.random.normal(key0, (2, 4, 16, 16), dtype=jnp.float32)
    y = interpolate_bilinear(x, scale_factor=2)
    jax.block_until_ready(y)
    assert y.shape == (2, 4, 32, 32), y.shape

    # Independent reference: jax.image.resize(method='linear') implements the
    # same half-pixel-center (align_corners=False) bilinear resampling as
    # torch.nn.functional.interpolate(mode='bilinear') for upsampling.
    y_ref = jax.image.resize(x, (2, 4, 32, 32), method="linear")
    err = float(jnp.max(jnp.abs(y - y_ref)))
    assert err < 1e-2, f"max abs err vs reference: {err}"

    # More channels -> several plane-groups per grid step (exercises the loop).
    x2 = jax.random.normal(key1, (2, 32, 16, 16), dtype=jnp.float32)
    y2 = interpolate_bilinear(x2, scale_factor=2)
    jax.block_until_ready(y2)
    assert y2.shape == (2, 32, 32, 32), y2.shape
    y2_ref = jax.image.resize(x2, (2, 32, 32, 32), method="linear")
    err2 = float(jnp.max(jnp.abs(y2 - y2_ref)))
    assert err2 < 1e-2, f"max abs err vs reference (case 2): {err2}"

    print("KERNEL_OK")
</pallas_src>

<mosaic_0001>
module attributes {stable_mosaic.version = 11 : i64} {
  func.func @_interp_kernel(%arg0: i32, %arg1: memref<256x128xf32, #tpu.memory_space<vmem>>, %arg2: memref<16x32xf32, #tpu.memory_space<vmem>>, %arg3: memref<128x16xf32, #tpu.memory_space<vmem>>, %arg4: memref<256x32xf32, #tpu.memory_space<vmem>>) attributes {dimension_semantics = [#tpu.dimension_semantics<parallel>], iteration_bounds = array<i64: 1>, scalar_prefetch = 0 : i64, scratch_operands = 0 : i64, tpu.core_type = #tpu.core_type<tc>, window_params = [{pipeline_mode = #tpu.pipeline_mode<synchronous>, transform_indices = @transform_0, window_bounds = array<i64: 256, 128>}, {pipeline_mode = #tpu.pipeline_mode<synchronous>, transform_indices = @transform_1, window_bounds = array<i64: 16, 32>}, {transform_indices = @transform_2, window_bounds = array<i64: 128, 16>}, {transform_indices = @transform_3, window_bounds = array<i64: 256, 32>}]} {
    %c0 = arith.constant 0 : index
    %c0_0 = arith.constant 0 : index
    %0 = vector.load %arg1[%c0, %c0_0] : memref<256x128xf32, #tpu.memory_space<vmem>>, vector<256x128xf32>
    %c0_1 = arith.constant 0 : index
    %c0_2 = arith.constant 0 : index
    %1 = vector.load %arg2[%c0_1, %c0_2] : memref<16x32xf32, #tpu.memory_space<vmem>>, vector<16x32xf32>
    %c0_3 = arith.constant 0 : index
    %c0_4 = arith.constant 0 : index
    %2 = vector.load %arg3[%c0_3, %c0_4] : memref<128x16xf32, #tpu.memory_space<vmem>>, vector<128x16xf32>
    %cst = arith.constant dense<0.000000e+00> : vector<256x16xf32>
    %3 = tpu.matmul %0, %2, %cst {dimension_numbers = #tpu.dot_dimension_numbers<[1], [0], [0], [1], [0, 0, 1, 1], [], []>} : vector<256x128xf32>, vector<128x16xf32>, vector<256x16xf32> -> vector<256x16xf32>
    %cst_5 = arith.constant dense<0.000000e+00> : vector<256x32xf32>
    %4 = tpu.matmul %3, %1, %cst_5 {dimension_numbers = #tpu.dot_dimension_numbers<[1], [0], [0], [1], [0, 0, 1, 1], [], []>} : vector<256x16xf32>, vector<16x32xf32>, vector<256x32xf32> -> vector<256x32xf32>
    %c0_6 = arith.constant 0 : index
    %c0_7 = arith.constant 0 : index
    %5 = vector.load %arg4[%c0_6, %c0_7] : memref<256x32xf32, #tpu.memory_space<vmem>>, vector<256x32xf32>
    tpu.vector_store %arg4[%c0_6, %c0_7], %4 {strides = array<i32>} : memref<256x32xf32, #tpu.memory_space<vmem>>, vector<256x32xf32>,
    return
  }
  func.func @transform_0(%arg0: i32) -> (i32, i32) {
    %c0_i32 = arith.constant 0 : i32
    %c0_i32_0 = arith.constant 0 : i32
    %c0_i32_1 = arith.constant 0 : i32
    return %c0_i32, %c0_i32_0 : i32, i32
  }
  func.func @transform_1(%arg0: i32) -> (i32, i32) {
    %c0_i32 = arith.constant 0 : i32
    %c0_i32_0 = arith.constant 0 : i32
    %c0_i32_1 = arith.constant 0 : i32
    return %c0_i32, %c0_i32_0 : i32, i32
  }
  func.func @transform_2(%arg0: i32) -> (i32, i32) {
    %c0_i32 = arith.constant 0 : i32
    %c0_i32_0 = arith.constant 0 : i32
    return %arg0, %c0_i32 : i32, i32
  }
  func.func @transform_3(%arg0: i32) -> (i32, i32) {
    %c0_i32 = arith.constant 0 : i32
    %c0_i32_0 = arith.constant 0 : i32
    return %arg0, %c0_i32 : i32, i32
  }
}

</mosaic_0001>

<bundles_post_ra>
// kernel: interpolate_bilinear.1
= control target key start
LH: loop header
LB: loop body
LE: loop exit
PB: predicated region body
PF: predicated region fallthrough
CT: control target
= control target key end

     0   :  { %8 = vsyncpa [#allocation3], 0  ;;  %s776_s0 = inlined_call_operand.hbm [shape: f32[256,128], index: 0, kind: input, shape index: {}]   ;;  %s777_s1 = inlined_call_operand.hbm [shape: f32[16,32], index: 1, kind: input, shape index: {}]   ;;  %s778_s2 = inlined_call_operand.hbm [shape: f32[128,16], index: 2, kind: input, shape index: {}]   ;;  %s779_s3 = inlined_call_operand.hbm [shape: f32[256,32], index: 3, kind: output, shape index: {}]  }
   0x1   :  { %9 = vsyncpa [#allocation6], 0 }
   0x2   :  { %10 = vsyncpa [#allocation4], 0  ;;  %s28_s14 = sshll.u32 %s777_s1, 4  ;;  %s662_s15 = smov [#allocation5]   ;;  %s29_s14 = int_to_ptr.hbm [resolvable:$true] %s28_s14 }
   0x3   :  { %s30_s16 = sshll.u32 %s662_s15, 4  ;;  %s15_s19 = sshll.u32 %s776_s0, 4  ;;  %s31_s16 = int_to_ptr.vmem [resolvable:$true] %s30_s16  ;;  %s16_s19 = int_to_ptr.hbm [resolvable:$true] %s15_s19 }
   0x4   :  { %s663_s20 = smov 128   ;;  %s664_s21 = smov 8  }
   0x5   :  { %36 = dma.hbm_to_vmem [thread:$0]  %s29_s14, 256, %s31_s16, [#allocation6], %s663_s20, %s663_s20, %s664_s21  }
   0x6   :  { %s665_s22 = smov [#allocation2]   ;;  %s41_s1 = sshll.u32 %s778_s2, 4  ;;  %s42_s1 = int_to_ptr.hbm [resolvable:$true] %s41_s1 }
   0x7   :  { %s17_s23 = sshll.u32 %s665_s22, 4  ;;  %s666_s0 = smov [#allocation7]   ;;  %s18_s23 = int_to_ptr.vmem [resolvable:$true] %s17_s23 }
   0x8   :  { %23 = dma.hbm_to_vmem [thread:$0]  %s16_s19, 4096, %s18_s23, [#allocation3], %s663_s20, %s663_s20, %s664_s21  }
   0x9   :  { %s43_s26 = sshll.u32 %s666_s0, 4  ;;  %s44_s26 = int_to_ptr.vmem [resolvable:$true] %s43_s26 }
   0xa   :  { %49 = dma.hbm_to_vmem [thread:$0]  %s42_s1, 2048, %s44_s26, [#allocation6], %s663_s20, %s663_s20, %s664_s21  }
   0xb   :  { %656 = dma.done.wait [#allocation3], 4096  }
   0xc   :  { %657 = vsyncadd [#allocation3], 4294963200 }
   0xd   :  { %658 = dma.done.wait [#allocation6], 2304  }
   0xe   :  { %659 = vsyncadd [#allocation6], 4294964992  ;;  %v111_v0 = vld [vmem:[#allocation7 + $0x78] sm:$0xff]  ;;  %v110_v1 = vld [vmem:[#allocation7 + $0x70] sm:$0xff]  ;;  %vm225_vm0 = vcmask 130048   ;;  %vm435_vm1 = vcmask 261120  }
   0xf   :  { %112 = vmatpush.msra.mxu0 %v111_v0  ;;  %520 = vmatpush.msra.mxu2 %v111_v0  ;;  %v109_v2 = vld [vmem:[#allocation7 + $0x68] sm:$0xff]  ;;  %v108_v3 = vld [vmem:[#allocation7 + $0x60] sm:$0xff]  ;;  %v107_v4 = vld [vmem:[#allocation7 + $0x58] sm:$0xff]  ;;  %s667_s2 = smov [#allocation8]   ;;  %s474_s30 = sshll.u32 %s779_s3, 4  ;;  %s475_s30 = int_to_ptr.hbm [resolvable:$true] %s474_s30 }
  0x10   :  { %521 = vmatpush.msra.mxu3 %v111_v0  ;;  %v106_v5 = vld [vmem:[#allocation7 + $0x50] sm:$0xff]  ;;  %v105_v6 = vld [vmem:[#allocation7 + $0x48] sm:$0xff]  ;;  %v104_v7 = vld [vmem:[#allocation7 + $0x40] sm:$0xff]  ;;  %s472_s27 = sshll.u32 %s667_s2, 4  ;;  %s473_s27 = int_to_ptr.vmem [resolvable:$true] %s472_s27 }
  0x11   :  { %113 = vmatpush.msra.mxu0 %v110_v1  ;;  %522 = vmatpush.msra.mxu2 %v110_v1  ;;  %v103_v8 = vld [vmem:[#allocation7 + $0x38] sm:$0xff]  ;;  %v102_v9 = vld [vmem:[#allocation7 + $0x30] sm:$0xff]  ;;  %v101_v10 = vld [vmem:[#allocation7 + $0x28] sm:$0xff] }
  0x12   :  { %523 = vmatpush.msra.mxu3 %v110_v1  ;;  %v100_v11 = vld [vmem:[#allocation7 + $0x20] sm:$0xff]  ;;  %v99_v12 = vld [vmem:[#allocation7 + $0x18] sm:$0xff]  ;;  %v98_v13 = vld [vmem:[#allocation7 + $0x10] sm:$0xff] }
  0x13   :  { %114 = vmatpush.msra.mxu0 %v109_v2  ;;  %524 = vmatpush.msra.mxu2 %v109_v2  ;;  %v97_v14 = vld [vmem:[#allocation7 + $0x8] sm:$0xff]  ;;  %v96_v15 = vld [vmem:[#allocation7] sm:$0xff]  ;;  %v62_v16 = vld [vmem:[#allocation2] sm:$0xff] }
  0x14   :  { %525 = vmatpush.msra.mxu3 %v109_v2  ;;  %v77_v17 = vld [vmem:[#allocation2 + $0x78] sm:$0xff]  ;;  %v63_v18 = vld [vmem:[#allocation2 + $0x8] sm:$0xff]  ;;  %v78_v19 = vld [vmem:[#allocation2 + $0x80] sm:$0xff] }
  0x15   :  { %115 = vmatpush.msra.mxu0 %v108_v3  ;;  %526 = vmatpush.msra.mxu2 %v108_v3  ;;  %v64_v20 = vld [vmem:[#allocation2 + $0x10] sm:$0xff]  ;;  %v79_v21 = vld [vmem:[#allocation2 + $0x88] sm:$0xff]  ;;  %v65_v22 = vld [vmem:[#allocation2 + $0x18] sm:$0xff] }
  0x16   :  { %527 = vmatpush.msra.mxu3 %v108_v3  ;;  %v80_v23 = vld [vmem:[#allocation2 + $0x90] sm:$0xff]  ;;  %v66_v24 = vld [vmem:[#allocation2 + $0x20] sm:$0xff]  ;;  %v81_v25 = vld [vmem:[#allocation2 + $0x98] sm:$0xff] }
  0x17   :  { %116 = vmatpush.msra.mxu0 %v107_v4  ;;  %528 = vmatpush.msra.mxu2 %v107_v4  ;;  %v67_v26 = vld [vmem:[#allocation2 + $0x28] sm:$0xff]  ;;  %v82_v27 = vld [vmem:[#allocation2 + $0xa0] sm:$0xff]  ;;  %v68_v28 = vld [vmem:[#allocation2 + $0x30] sm:$0xff] }
  0x18   :  { %529 = vmatpush.msra.mxu3 %v107_v4  ;;  %v83_v29 = vld [vmem:[#allocation2 + $0xa8] sm:$0xff]  ;;  %v69_v30 = vld [vmem:[#allocation2 + $0x38] sm:$0xff]  ;;  %v84_v31 = vld [vmem:[#allocation2 + $0xb0] sm:$0xff] }
  0x19   :  { %117 = vmatpush.msra.mxu0 %v106_v5  ;;  %530 = vmatpush.msra.mxu2 %v106_v5  ;;  %v70_v32 = vld [vmem:[#allocation2 + $0x40] sm:$0xff]  ;;  %v85_v33 = vld [vmem:[#allocation2 + $0xb8] sm:$0xff]  ;;  %v71_v34 = vld [vmem:[#allocation2 + $0x48] sm:$0xff] }
  0x1a   :  { %531 = vmatpush.msra.mxu3 %v106_v5  ;;  %v86_v35 = vld [vmem:[#allocation2 + $0xc0] sm:$0xff]  ;;  %v72_v36 = vld [vmem:[#allocation2 + $0x50] sm:$0xff]  ;;  %v87_v37 = vld [vmem:[#allocation2 + $0xc8] sm:$0xff] }
  0x1b   :  { %118 = vmatpush.msra.mxu0 %v105_v6  ;;  %532 = vmatpush.msra.mxu2 %v105_v6  ;;  %v73_v38 = vld [vmem:[#allocation2 + $0x58] sm:$0xff]  ;;  %v88_v39 = vld [vmem:[#allocation2 + $0xd0] sm:$0xff]  ;;  %v95_v40 = vld [vmem:[#allocation5 + $0x8] sm:$0xff] }
  0x1c   :  { %533 = vmatpush.msra.mxu3 %v105_v6  ;;  %336 = vmatpush.msra.mxu1 %v95_v40  ;;  %v94_v41 = vld [vmem:[#allocation5] sm:$0xff]  ;;  %v89_v43 = vld [vmem:[#allocation2 + $0xd8] sm:$0xff]  ;;  %v75_v45 = vld [vmem:[#allocation2 + $0x68] sm:$0xff] }
  0x1d   :  { %119 = vmatpush.msra.mxu0 %v104_v7  ;;  %534 = vmatpush.msra.mxu2 %v104_v7  ;;  %v74_v42 = vld [vmem:[#allocation2 + $0x60] sm:$0xff]  ;;  %v93_v44 = vld [vmem:[#allocation2 + $0xf8] sm:$0xff]  ;;  %v76_v47 = vld [vmem:[#allocation2 + $0x70] sm:$0xff] }
  0x1e   :  { %535 = vmatpush.msra.mxu3 %v104_v7  ;;  %337 = vmatpush.msra.mxu1 %v94_v41  ;;  %v90_v46 = vld [vmem:[#allocation2 + $0xe0] sm:$0xff]  ;;  %v91_v48 = vld [vmem:[#allocation2 + $0xe8] sm:$0xff]  ;;  %v92_v49 = vld [vmem:[#allocation2 + $0xf0] sm:$0xff] }
  0x1f   :  { %120 = vmatpush.msra.mxu0 %v103_v8  ;;  %536 = vmatpush.msra.mxu2 %v103_v8 }
  0x20   :  { %537 = vmatpush.msra.mxu3 %v103_v8 }
  0x21   :  { %121 = vmatpush.msra.mxu0 %v102_v9  ;;  %538 = vmatpush.msra.mxu2 %v102_v9 }
  0x22   :  { %539 = vmatpush.msra.mxu3 %v102_v9 }
  0x23   :  { %122 = vmatpush.msra.mxu0 %v101_v10  ;;  %540 = vmatpush.msra.mxu2 %v101_v10 }
  0x24   :  { %541 = vmatpush.msra.mxu3 %v101_v10 }
  0x25   :  { %123 = vmatpush.msra.mxu0 %v100_v11  ;;  %542 = vmatpush.msra.mxu2 %v100_v11 }
  0x26   :  { %543 = vmatpush.msra.mxu3 %v100_v11 }
  0x27   :  { %124 = vmatpush.msra.mxu0 %v99_v12  ;;  %544 = vmatpush.msra.mxu2 %v99_v12 }
  0x28   :  { %545 = vmatpush.msra.mxu3 %v99_v12 }
  0x29   :  { %125 = vmatpush.msra.mxu0 %v98_v13  ;;  %546 = vmatpush.msra.mxu2 %v98_v13 }
  0x2a   :  { %547 = vmatpush.msra.mxu3 %v98_v13 }
  0x2b   :  { %126 = vmatpush.msra.mxu0 %v97_v14  ;;  %548 = vmatpush.msra.mxu2 %v97_v14 }
  0x2c   :  { %549 = vmatpush.msra.mxu3 %v97_v14 }
  0x2d   :  { %127 = vmatpush.msra.mxu0 %v96_v15  ;;  %550 = vmatpush.msra.mxu2 %v96_v15 }
  0x2e   :  { %128 = vmatmul.f32.vlgmr.msra.gmra.mxu0 %v62_v16  ;;  %173 = vmatmul.f32.vlgmr.msra.gmra.mxu2 %v77_v17 }
  0x2f   :  { %551 = vmatpush.msra.mxu3 %v96_v15 }
  0x30   :  { %221 = vmatmul.f32.vlgmr.msra.gmra.mxu3 %v93_v44 }
  0x31   :  { %552 = vmatpush.msrb.mxu3 %v95_v40 }
  0x33   :  { %553 = vmatpush.msrb.mxu3 %v94_v41 }
  0x36   :  { %131 = vmatmul.f32.gmra.mxu0 %v63_v18  ;;  %176 = vmatmul.f32.gmra.mxu2 %v78_v19 }
  0x3e   :  { %134 = vmatmul.f32.gmra.mxu0 %v64_v20  ;;  %179 = vmatmul.f32.gmra.mxu2 %v79_v21 }
  0x46   :  { %137 = vmatmul.f32.gmra.mxu0 %v65_v22  ;;  %182 = vmatmul.f32.gmra.mxu2 %v80_v23 }
  0x4e   :  { %140 = vmatmul.f32.gmra.mxu0 %v66_v24  ;;  %185 = vmatmul.f32.gmra.mxu2 %v81_v25 }
  0x56   :  { %143 = vmatmul.f32.gmra.mxu0 %v67_v26  ;;  %188 = vmatmul.f32.gmra.mxu2 %v82_v27 }
  0x5e   :  { %146 = vmatmul.f32.gmra.mxu0 %v68_v28  ;;  %191 = vmatmul.f32.gmra.mxu2 %v83_v29 }
  0x66   :  { %149 = vmatmul.f32.gmra.mxu0 %v69_v30  ;;  %194 = vmatmul.f32.gmra.mxu2 %v84_v31 }
  0x6e   :  { %152 = vmatmul.f32.gmra.mxu0 %v70_v32  ;;  %197 = vmatmul.f32.gmra.mxu2 %v85_v33 }
  0x76   :  { %155 = vmatmul.f32.gmra.mxu0 %v71_v34  ;;  %200 = vmatmul.f32.gmra.mxu2 %v86_v35 }
  0x7e   :  { %158 = vmatmul.f32.gmra.mxu0 %v72_v36  ;;  %203 = vmatmul.f32.gmra.mxu2 %v87_v37 }
  0x86   :  { %161 = vmatmul.f32.gmra.mxu0 %v73_v38  ;;  %206 = vmatmul.f32.gmra.mxu2 %v88_v39 }
  0x8e   :  { %164 = vmatmul.f32.gmra.mxu0 %v74_v42  ;;  %209 = vmatmul.f32.gmra.mxu2 %v89_v43 }
  0x96   :  { %167 = vmatmul.f32.gmra.mxu0 %v75_v45  ;;  %212 = vmatmul.f32.gmra.mxu2 %v90_v46 }
  0x9e   :  { %170 = vmatmul.f32.gmra.mxu0 %v76_v47  ;;  %215 = vmatmul.f32.gmra.mxu2 %v91_v48 }
  0xa6   :  { %218 = vmatmul.f32.gmra.mxu2 %v92_v49 }
  0xab   :  { %v129_v50 = vpop.f32.mrf.mxu0 }
  0xac   :  { %488 = vmatmul.msk.f32.vlgmr.msra.gmra.mxu1 %vm225_vm0, %v129_v50 }
  0xb1   :  { %v174_v51 = vpop.f32.mrf.mxu2 }
  0xb3   :  { %v132_v52 = vpop.f32.mrf.mxu0  ;;  %v222_v18 = vpop.f32.mrf.mxu3 }
  0xb4   :  { %489 = vmatmul.msk.f32.gmra.mxu1 %vm225_vm0, %v132_v52 }
  0xb9   :  { %v177_v53 = vpop.f32.mrf.mxu2 }
  0xbb   :  { %v135_v54 = vpop.f32.mrf.mxu0 }
  0xbc   :  { %490 = vmatmul.msk.f32.gmra.mxu1 %vm225_vm0, %v135_v54 }
  0xc1   :  { %v180_v55 = vpop.f32.mrf.mxu2 }
  0xc3   :  { %v138_v56 = vpop.f32.mrf.mxu0 }
  0xc4   :  { %491 = vmatmul.msk.f32.gmra.mxu1 %vm225_vm0, %v138_v56 }
  0xc9   :  { %v183_v57 = vpop.f32.mrf.mxu2 }
  0xca   :  { %506 = vmatmul.msk.f32.vlgmr.msrb.gmra.mxu3 %vm225_vm0, %v183_v57 }
  0xcb   :  { %v141_v58 = vpop.f32.mrf.mxu0 }
  0xcc   :  { %492 = vmatmul.msk.f32.gmra.mxu1 %vm225_vm0, %v141_v58 }
  0xd1   :  { %v186_v59 = vpop.f32.mrf.mxu2 }
  0xd2   :  { %507 = vmatmul.msk.f32.gmra.mxu3 %vm225_vm0, %v186_v59 }
  0xd3   :  { %v144_v60 = vpop.f32.mrf.mxu0 }
  0xd4   :  { %493 = vmatmul.msk.f32.gmra.mxu1 %vm225_vm0, %v144_v60 }
  0xd9   :  { %v189_v61 = vpop.f32.mrf.mxu2 }
  0xda   :  { %508 = vmatmul.msk.f32.gmra.mxu3 %vm225_vm0, %v189_v61 }
  0xdb   :  { %v147_v62 = vpop.f32.mrf.mxu0 }
  0xdc   :  { %494 = vmatmul.msk.f32.gmra.mxu1 %vm225_vm0, %v147_v62 }
  0xe1   :  { %v192_v63 = vpop.f32.mrf.mxu2 }
  0xe2   :  { %509 = vmatmul.msk.f32.gmra.mxu3 %vm225_vm0, %v192_v63 }
  0xe3   :  { %v150_v0 = vpop.f32.mrf.mxu0 }
  0xe4   :  { %495 = vmatmul.msk.f32.gmra.mxu1 %vm225_vm0, %v150_v0 }
  0xe9   :  { %v195_v1 = vpop.f32.mrf.mxu2 }
  0xea   :  { %510 = vmatmul.msk.f32.gmra.mxu3 %vm225_vm0, %v195_v1 }
  0xeb   :  { %v153_v2 = vpop.f32.mrf.mxu0 }
  0xec   :  { %496 = vmatmul.msk.f32.gmra.mxu1 %vm225_vm0, %v153_v2 }
  0xf1   :  { %v198_v3 = vpop.f32.mrf.mxu2 }
  0xf2   :  { %511 = vmatmul.msk.f32.gmra.mxu3 %vm225_vm0, %v198_v3 }
  0xf3   :  { %v156_v4 = vpop.f32.mrf.mxu0 }
  0xf4   :  { %497 = vmatmul.msk.f32.gmra.mxu1 %vm225_vm0, %v156_v4 }
  0xf9   :  { %v201_v5 = vpop.f32.mrf.mxu2 }
  0xfa   :  { %512 = vmatmul.msk.f32.gmra.mxu3 %vm225_vm0, %v201_v5 }
  0xfb   :  { %v159_v6 = vpop.f32.mrf.mxu0 }
  0xfc   :  { %498 = vmatmul.msk.f32.gmra.mxu1 %vm225_vm0, %v159_v6 }
 0x101   :  { %v204_v7 = vpop.f32.mrf.mxu2 }
 0x102   :  { %513 = vmatmul.msk.f32.gmra.mxu3 %vm225_vm0, %v204_v7 }
 0x103   :  { %v162_v8 = vpop.f32.mrf.mxu0 }
 0x104   :  { %499 = vmatmul.msk.f32.gmra.mxu1 %vm225_vm0, %v162_v8 }
 0x109   :  { %v207_v9 = vpop.f32.mrf.mxu2 }
 0x10a   :  { %514 = vmatmul.msk.f32.gmra.mxu3 %vm225_vm0, %v207_v9 }
 0x10b   :  { %v165_v10 = vpop.f32.mrf.mxu0 }
 0x10c   :  { %500 = vmatmul.msk.f32.gmra.mxu1 %vm225_vm0, %v165_v10 }
 0x111   :  { %v210_v11 = vpop.f32.mrf.mxu2 }
 0x112   :  { %515 = vmatmul.msk.f32.gmra.mxu3 %vm225_vm0, %v210_v11 }
 0x113   :  { %v168_v12 = vpop.f32.mrf.mxu0 }
 0x114   :  { %501 = vmatmul.msk.f32.gmra.mxu1 %vm225_vm0, %v168_v12 }
 0x119   :  { %v213_v13 = vpop.f32.mrf.mxu2 }
 0x11a   :  { %516 = vmatmul.msk.f32.gmra.mxu3 %vm225_vm0, %v213_v13 }
 0x11b   :  { %v171_v14 = vpop.f32.mrf.mxu0 }
 0x11c   :  { %502 = vmatmul.msk.f32.gmra.mxu1 %vm225_vm0, %v171_v14 }
 0x121   :  { %v216_v15 = vpop.f32.mrf.mxu2 }
 0x122   :  { %517 = vmatmul.msk.f32.gmra.mxu3 %vm225_vm0, %v216_v15 }
 0x124   :  { %503 = vmatmul.msk.f32.gmra.mxu1 %vm225_vm0, %v174_v51 }
 0x129   :  { %v219_v16 = vpop.f32.mrf.mxu2  ;;  %v339_v17 = vpop.f32.mrf.mxu1 }
 0x12a   :  { %436 = vst.msk [vmem:[#allocation8] sm:$0xff] %vm435_vm1, %v339_v17  ;;  %518 = vmatmul.msk.f32.gmra.mxu3 %vm225_vm0, %v219_v16 }
 0x12c   :  { %504 = vmatmul.msk.f32.gmra.mxu1 %vm225_vm0, %v177_v53 }
 0x131   :  { %v342_v19 = vpop.f32.mrf.mxu1 }
 0x132   :  { %437 = vst.msk [vmem:[#allocation8 + $0x8] sm:$0xff] %vm435_vm1, %v342_v19  ;;  %519 = vmatmul.msk.f32.gmra.mxu3 %vm225_vm0, %v222_v18 }
 0x134   :  { %505 = vmatmul.msk.f32.gmra.mxu1 %vm225_vm0, %v180_v55 }
 0x139   :  { %v345_v20 = vpop.f32.mrf.mxu1 }
 0x13a   :  { %438 = vst.msk [vmem:[#allocation8 + $0x10] sm:$0xff] %vm435_vm1, %v345_v20 }
 0x141   :  { %v348_v21 = vpop.f32.mrf.mxu1 }
 0x142   :  { %439 = vst.msk [vmem:[#allocation8 + $0x18] sm:$0xff] %vm435_vm1, %v348_v21 }
 0x149   :  { %v351_v22 = vpop.f32.mrf.mxu1 }
 0x14a   :  { %440 = vst.msk [vmem:[#allocation8 + $0x20] sm:$0xff] %vm435_vm1, %v351_v22 }
 0x14d   :  { %v393_v23 = vpop.f32.mrf.mxu3 }
 0x14e   :  { %454 = vst.msk [vmem:[#allocation8 + $0x90] sm:$0xff] %vm435_vm1, %v393_v23 }
 0x151   :  { %v354_v24 = vpop.f32.mrf.mxu1 }
 0x152   :  { %441 = vst.msk [vmem:[#allocation8 + $0x28] sm:$0xff] %vm435_vm1, %v354_v24 }
 0x155   :  { %v396_v25 = vpop.f32.mrf.mxu3 }
 0x156   :  { %455 = vst.msk [vmem:[#allocation8 + $0x98] sm:$0xff] %vm435_vm1, %v396_v25 }
 0x159   :  { %v357_v26 = vpop.f32.mrf.mxu1 }
 0x15a   :  { %442 = vst.msk [vmem:[#allocation8 + $0x30] sm:$0xff] %vm435_vm1, %v357_v26 }
 0x15d   :  { %v399_v27 = vpop.f32.mrf.mxu3 }
 0x15e   :  { %456 = vst.msk [vmem:[#allocation8 + $0xa0] sm:$0xff] %vm435_vm1, %v399_v27 }
 0x161   :  { %v360_v28 = vpop.f32.mrf.mxu1 }
 0x162   :  { %443 = vst.msk [vmem:[#allocation8 + $0x38] sm:$0xff] %vm435_vm1, %v360_v28 }
 0x165   :  { %v402_v29 = vpop.f32.mrf.mxu3 }
 0x166   :  { %457 = vst.msk [vmem:[#allocation8 + $0xa8] sm:$0xff] %vm435_vm1, %v402_v29 }
 0x169   :  { %v363_v30 = vpop.f32.mrf.mxu1 }
 0x16a   :  { %444 = vst.msk [vmem:[#allocation8 + $0x40] sm:$0xff] %vm435_vm1, %v363_v30 }
 0x16d   :  { %v405_v31 = vpop.f32.mrf.mxu3 }
 0x16e   :  { %458 = vst.msk [vmem:[#allocation8 + $0xb0] sm:$0xff] %vm435_vm1, %v405_v31 }
 0x171   :  { %v366_v32 = vpop.f32.mrf.mxu1 }
 0x172   :  { %445 = vst.msk [vmem:[#allocation8 + $0x48] sm:$0xff] %vm435_vm1, %v366_v32 }
 0x175   :  { %v408_v33 = vpop.f32.mrf.mxu3 }
 0x176   :  { %459 = vst.msk [vmem:[#allocation8 + $0xb8] sm:$0xff] %vm435_vm1, %v408_v33 }
 0x179   :  { %v369_v34 = vpop.f32.mrf.mxu1 }
 0x17a   :  { %446 = vst.msk [vmem:[#allocation8 + $0x50] sm:$0xff] %vm435_vm1, %v369_v34 }
 0x17d   :  { %v411_v35 = vpop.f32.mrf.mxu3 }
 0x17e   :  { %460 = vst.msk [vmem:[#allocation8 + $0xc0] sm:$0xff] %vm435_vm1, %v411_v35 }
 0x181   :  { %v372_v36 = vpop.f32.mrf.mxu1 }
 0x182   :  { %447 = vst.msk [vmem:[#allocation8 + $0x58] sm:$0xff] %vm435_vm1, %v372_v36 }
 0x185   :  { %v414_v37 = vpop.f32.mrf.mxu3 }
 0x186   :  { %461 = vst.msk [vmem:[#allocation8 + $0xc8] sm:$0xff] %vm435_vm1, %v414_v37 }
 0x189   :  { %v375_v38 = vpop.f32.mrf.mxu1 }
 0x18a   :  { %448 = vst.msk [vmem:[#allocation8 + $0x60] sm:$0xff] %vm435_vm1, %v375_v38 }
 0x18d   :  { %v417_v39 = vpop.f32.mrf.mxu3 }
 0x18e   :  { %462 = vst.msk [vmem:[#allocation8 + $0xd0] sm:$0xff] %vm435_vm1, %v417_v39 }
 0x191   :  { %v378_v40 = vpop.f32.mrf.mxu1 }
 0x192   :  { %449 = vst.msk [vmem:[#allocation8 + $0x68] sm:$0xff] %vm435_vm1, %v378_v40 }
 0x195   :  { %v420_v41 = vpop.f32.mrf.mxu3 }
 0x196   :  { %463 = vst.msk [vmem:[#allocation8 + $0xd8] sm:$0xff] %vm435_vm1, %v420_v41 }
 0x199   :  { %v381_v42 = vpop.f32.mrf.mxu1 }
 0x19a   :  { %450 = vst.msk [vmem:[#allocation8 + $0x70] sm:$0xff] %vm435_vm1, %v381_v42 }
 0x19d   :  { %v423_v43 = vpop.f32.mrf.mxu3 }
 0x19e   :  { %464 = vst.msk [vmem:[#allocation8 + $0xe0] sm:$0xff] %vm435_vm1, %v423_v43 }
 0x1a1   :  { %v384_v44 = vpop.f32.mrf.mxu1 }
 0x1a2   :  { %451 = vst.msk [vmem:[#allocation8 + $0x78] sm:$0xff] %vm435_vm1, %v384_v44 }
 0x1a5   :  { %v426_v45 = vpop.f32.mrf.mxu3 }
 0x1a6   :  { %465 = vst.msk [vmem:[#allocation8 + $0xe8] sm:$0xff] %vm435_vm1, %v426_v45 }
 0x1a9   :  { %v387_v46 = vpop.f32.mrf.mxu1 }
 0x1aa   :  { %452 = vst.msk [vmem:[#allocation8 + $0x80] sm:$0xff] %vm435_vm1, %v387_v46 }
 0x1ad   :  { %v429_v47 = vpop.f32.mrf.mxu3 }
 0x1ae   :  { %466 = vst.msk [vmem:[#allocation8 + $0xf0] sm:$0xff] %vm435_vm1, %v429_v47 }
 0x1b1   :  { %v390_v48 = vpop.f32.mrf.mxu1 }
 0x1b2   :  { %453 = vst.msk [vmem:[#allocation8 + $0x88] sm:$0xff] %vm435_vm1, %v390_v48 }
 0x1b5   :  { %v432_v49 = vpop.f32.mrf.mxu3 }
 0x1b6   :  { %467 = vst.msk [vmem:[#allocation8 + $0xf8] sm:$0xff] %vm435_vm1, %v432_v49 }
 0x1b7   :  { %480 = dma.vmem_to_hbm [thread:$0]  %s473_s27, 4096, %s475_s30, [#allocation4], %s663_s20, %s663_s20, %s664_s21  }
 0x1b8   :  { %660 = dma.done.wait [#allocation4], 4096  }
 0x1b9   :  { %661 = vsyncadd [#allocation4], 4294963200 }
 0x1ba   :  { %485 = vsyncpa [#allocation3], 1 }
 0x1bb   :  { %486 = vsyncpa [#allocation6], 1 }
 0x1bc   :  { %487 = vsyncpa [#allocation4], 1 }

</bundles_post_ra>
